<compile_context>
chip_gen: v7x
topology: tpu7x:2x2x1
jax: 0.10.0
libtpu: 0.0.40
codegen_flags: <defaults>
</compile_context>

<pallas_src>
import math
from typing import NamedTuple, Optional

import jax
import jax.numpy as jnp
from jax.experimental import pallas as pl
from jax.experimental.pallas import tpu as pltpu


def _round_up(n, m):
    return ((n + m - 1) // m) * m


def _cdiv(a, b):
    return -(-a // b)


def _vmem_capacity_bytes():
    """Physical VMEM bytes, with a conservative fallback valid on every gen."""
    try:
        info = pltpu.get_tpu_info()
        cap = getattr(info, "vmem_capacity_bytes", None)
        if cap:
            return int(cap)
    except Exception:
        pass
    return 64 * 1024 * 1024


# ----------------------------------------------------------------------------
# Kernels
# ----------------------------------------------------------------------------
def _ffn_kernel_fused(x_ref, w1_ref, b1_ref, w2_ref, b2_ref, o_ref):
    """Partial products of the 2nd matmul accumulate directly into o_ref.

    Valid when n_f == 1 (any output dtype) or the output dtype is f32
    (exact accumulation).  Output block index is constant across the f axis,
    so o_ref stays resident in VMEM until the last f step.
    """
    f = pl.program_id(1)

    # h = relu(x @ W1_tile + b1_tile)  -- f32 accumulation, f32 VPU math.
    h = jnp.dot(x_ref[...], w1_ref[...], preferred_element_type=jnp.float32)
    h = jnp.maximum(h + b1_ref[...], 0.0)

    # Partial y = h @ W2_tile (cast h to the MXU operand dtype).
    y = jnp.dot(h.astype(w2_ref.dtype), w2_ref[...],
                preferred_element_type=jnp.float32)

    @pl.when(f == 0)
    def _():
        o_ref[...] = (y + b2_ref[...]).astype(o_ref.dtype)

    @pl.when(f > 0)
    def _():
        o_ref[...] = (o_ref[...] + y).astype(o_ref.dtype)


def _ffn_kernel_scratch(x_ref, w1_ref, b1_ref, w2_ref, b2_ref, o_ref, acc_ref):
    """f32 scratch accumulation: used when out dtype is narrow and n_f > 1."""
    f = pl.program_id(1)

    h = jnp.dot(x_ref[...], w1_ref[...], preferred_element_type=jnp.float32)
    h = jnp.maximum(h + b1_ref[...], 0.0)
    y = jnp.dot(h.astype(w2_ref.dtype), w2_ref[...],
                preferred_element_type=jnp.float32)

    @pl.when(f == 0)
    def _():
        acc_ref[...] = y          # first step writes (no zero-init pass)

    @pl.when(f > 0)
    def _():
        acc_ref[...] += y

    @pl.when(f == pl.num_programs(1) - 1)
    def _():
        o_ref[...] = (acc_ref[...] + b2_ref[...]).astype(o_ref.dtype)


# ----------------------------------------------------------------------------
# Parameter preparation (hoisted out of the per-call hot path)
# ----------------------------------------------------------------------------
class FFNParams(NamedTuple):
    w1p: jax.Array   # (d_model_p, d_ff_p)   compute dtype
    b1p: jax.Array   # (1, d_ff_p)           f32
    w2p: jax.Array   # (d_ff_p, d_model_p)   compute dtype
    b2p: jax.Array   # (1, d_model_p)        f32
    d_model: int
    d_ff: int
    d_model_p: int
    d_ff_p: int


def prepare_ffn_params(w1, b1, w2, b2, *, compute_dtype=jnp.bfloat16):
    """Cast + lane-pad the FFN weights once; reuse across calls."""
    d_model, d_ff = w1.shape
    d_model_p = _round_up(d_model, 128)
    d_ff_p = _round_up(d_ff, 128)
    w1p = jnp.pad(w1.astype(compute_dtype),
                  ((0, d_model_p - d_model), (0, d_ff_p - d_ff)))
    b1p = jnp.pad(b1.astype(jnp.float32).reshape(1, d_ff),
                  ((0, 0), (0, d_ff_p - d_ff)))
    w2p = jnp.pad(w2.astype(compute_dtype),
                  ((0, d_ff_p - d_ff), (0, d_model_p - d_model)))
    b2p = jnp.pad(b2.astype(jnp.float32).reshape(1, d_model),
                  ((0, 0), (0, d_model_p - d_model)))
    return FFNParams(w1p, b1p, w2p, b2p, d_model, d_ff, d_model_p, d_ff_p)


# ----------------------------------------------------------------------------
# Tile selection against the VMEM budget
# ----------------------------------------------------------------------------
def _select_tiles(M, d_model_p, d_ff_p, cd_bytes, out_bytes, budget,
                  tf_cap: Optional[int]):
    # Target row tile from available VMEM (roofline wants large tm:
    # arithmetic intensity ~= tm FLOPs per weight byte).
    if budget >= 80 * 1024 * 1024:
        tm_target = 1024          # 128-MiB VMEM chips (v5e / v6e)
    elif budget >= 40 * 1024 * 1024:
        tm_target = 512           # 64-MiB VMEM chips (v7x)
    else:
        tm_target = 256

    # tf candidates: 128-multiple divisors of d_ff_p (no d_ff over-padding),
    # largest first so we prefer resident weights (tf == d_ff_p).
    n128 = d_ff_p // 128
    tf_divs = [k * 128 for k in range(n128, 0, -1) if n128 % k == 0]
    if tf_cap is not None:
        cap = max(128, (tf_cap // 128) * 128)
        tf_divs = [t for t in tf_divs if t <= cap] or [128]

    def vmem_est(tm, tf):
        est = 2 * tm * d_model_p * cd_bytes              # x blocks (dbl-buffered)
        est += 2 * d_model_p * tf * cd_bytes             # W1 blocks
        est += 2 * tf * d_model_p * cd_bytes             # W2 blocks
        est += 2 * 8 * tf * 4 + 2 * 8 * d_model_p * 4    # bias blocks
        est += 2 * tm * d_model_p * out_bytes            # out blocks
        est += tm * tf * (4 + cd_bytes)                  # h (f32) + bf16 cast
        est += tm * d_model_p * 4                        # acc scratch (worst)
        return est

    tm_t = tm_target
    while True:
        n_i = _cdiv(M, tm_t)
        if n_i == 1 and M >= 1024:
            n_i = 2               # keep >= 2 row tiles so 2-TC chips can split
        tm_eff = min(_round_up(_cdiv(M, n_i), 8), _round_up(M, 8))
        for tf in tf_divs:
            if vmem_est(tm_eff, tf) <= budget:
                return tm_eff, n_i, tf, vmem_est(tm_eff, tf)
        if tm_t <= 128:
            tf = tf_divs[-1]
            return tm_eff, n_i, tf, vmem_est(tm_eff, tf)
        tm_t //= 2


# ----------------------------------------------------------------------------
# Wrapper
# ----------------------------------------------------------------------------
def position_wise_feed_forward(x, params: FFNParams, *,
                               compute_dtype=jnp.bfloat16,
                               out_dtype=None,
                               tf_cap: Optional[int] = None):
    """x: [..., d_model]; params from prepare_ffn_params (call once)."""
    orig_shape = x.shape
    d_model = orig_shape[-1]
    assert d_model == params.d_model, "x last dim must match d_model"
    d_model_p, d_ff_p = params.d_model_p, params.d_ff_p
    M = math.prod(orig_shape[:-1])
    out_dtype = x.dtype if out_dtype is None else out_dtype

    cd_bytes = jnp.dtype(compute_dtype).itemsize
    out_bytes = jnp.dtype(out_dtype).itemsize

    capacity = _vmem_capacity_bytes()
    budget = (capacity * 78) // 100

    tm_eff, n_i, tf_eff, est = _select_tiles(
        M, d_model_p, d_ff_p, cd_bytes, out_bytes, budget, tf_cap)
    n_f = d_ff_p // tf_eff
    M_p = n_i * tm_eff

    # Only the activations are cast/padded per call (weights are pre-prepared).
    x2d = jnp.pad(x.reshape(M, d_model).astype(compute_dtype),
                  ((0, M_p - M), (0, d_model_p - d_model)))

    # f32 output (the default, matching PyTorch f32 params) accumulates
    # directly into o_ref; narrow outputs with multiple f steps need scratch.
    use_scratch = (n_f > 1) and (jnp.dtype(out_dtype) != jnp.dtype(jnp.float32))
    kernel = _ffn_kernel_scratch if use_scratch else _ffn_kernel_fused
    scratch_shapes = ([pltpu.VMEM((tm_eff, d_model_p), jnp.float32)]
                      if use_scratch else [])

    vmem_limit = int(min(capacity * 9 // 10,
                         max(est * 5 // 4, 32 * 1024 * 1024)))

    cost = pl.CostEstimate(
        flops=4 * M_p * d_model_p * d_ff_p,
        transcendentals=0,
        bytes_accessed=(x2d.size * cd_bytes
                        + params.w1p.size * cd_bytes
                        + params.w2p.size * cd_bytes
                        + params.b1p.size * 4 + params.b2p.size * 4
                        + M_p * d_model_p * out_bytes),
    )

    out2d = pl.pallas_call(
        kernel,
        out_shape=jax.ShapeDtypeStruct((M_p, d_model_p), out_dtype),
        grid_spec=pltpu.PrefetchScalarGridSpec(
            num_scalar_prefetch=0,
            grid=(n_i, n_f),
            in_specs=[
                pl.BlockSpec((tm_eff, d_model_p), lambda i, f: (i, 0)),  # x rows
                pl.BlockSpec((d_model_p, tf_eff), lambda i, f: (0, f)),  # W1 tile
                pl.BlockSpec((1, tf_eff), lambda i, f: (0, f)),          # b1 tile
                pl.BlockSpec((tf_eff, d_model_p), lambda i, f: (f, 0)),  # W2 tile
                pl.BlockSpec((1, d_model_p), lambda i, f: (0, 0)),       # b2
            ],
            out_specs=pl.BlockSpec((tm_eff, d_model_p), lambda i, f: (i, 0)),
            scratch_shapes=scratch_shapes,
        ),
        compiler_params=pltpu.CompilerParams(
            dimension_semantics=("parallel", "arbitrary"),
            vmem_limit_bytes=vmem_limit,
        ),
        cost_estimate=cost,
    )(x2d, params.w1p, params.b1p, params.w2p, params.b2p)

    return out2d[:M, :d_model].reshape(orig_shape).astype(out_dtype)


# ----------------------------------------------------------------------------
# Reference + test harness
# ----------------------------------------------------------------------------
def _reference(x, w1, b1, w2, b2, compute_dtype=jnp.bfloat16):
    """Pure-JAX mirror of the kernel math (bf16 operands, f32 accumulation)."""
    cd = compute_dtype
    h = jnp.dot(x.astype(cd), w1.astype(cd),
                preferred_element_type=jnp.float32) + b1.astype(jnp.float32)
    h = jnp.maximum(h, 0.0)
    y = jnp.dot(h.astype(cd), w2.astype(cd),
                preferred_element_type=jnp.float32) + b2.astype(jnp.float32)
    return y.astype(x.dtype)


def _make_params(key, d_model, d_ff):
    kw1, kb1, kw2, kb2 = jax.random.split(key, 4)
    bound1 = 1.0 / (d_model ** 0.5)
    bound2 = 1.0 / (d_ff ** 0.5)
    w1 = jax.random.uniform(kw1, (d_model, d_ff), jnp.float32, -bound1, bound1)
    b1 = jax.random.uniform(kb1, (d_ff,), jnp.float32, -bound1, bound1)
    w2 = jax.random.uniform(kw2, (d_ff, d_model), jnp.float32, -bound2, bound2)
    b2 = jax.random.uniform(kb2, (d_model,), jnp.float32, -bound2, bound2)
    return w1, b1, w2, b2


if __name__ == "__main__":
    key = jax.random.PRNGKey(0)

    # --- Case 1: small module-consistent shapes (resident weights, n_f=1) ---
    batch, seq, d_model, d_ff = 2, 8, 32, 64
    kx, kp, krest = jax.random.split(key, 3)
    x = jax.random.normal(kx, (batch, seq, d_model), dtype=jnp.float32)
    w1, b1, w2, b2 = _make_params(kp, d_model, d_ff)
    params = prepare_ffn_params(w1, b1, w2, b2)

    out = jax.block_until_ready(position_wise_feed_forward(x, params))
    ref = _reference(x.reshape(-1, d_model), w1, b1, w2, b2).reshape(x.shape)
    assert out.shape == (batch, seq, d_model)
    assert jnp.allclose(out, ref, atol=1e-2, rtol=1e-2), "case 1 mismatch"

    # --- Case 2: multi-row, resident-weight path (near-full last row tile) ---
    batch2, seq2, d_model2, d_ff2 = 3, 100, 256, 1024
    kx2, kp2, krest = jax.random.split(krest, 3)
    x2 = jax.random.normal(kx2, (batch2, seq2, d_model2), dtype=jnp.float32)
    w1b, b1b, w2b, b2b = _make_params(kp2, d_model2, d_ff2)
    params2 = prepare_ffn_params(w1b, b1b, w2b, b2b)

    out2 = jax.block_until_ready(position_wise_feed_forward(x2, params2))
    ref2 = _reference(x2.reshape(-1, d_model2), w1b, b1b, w2b, b2b).reshape(x2.shape)
    assert out2.shape == (batch2, seq2, d_model2)
    assert jnp.allclose(out2, ref2, atol=2e-2, rtol=2e-2), "case 2 mismatch"

    # --- Case 3: force weight streaming (n_f>1, f32 accumulate-into-output) ---
    out3 = jax.block_until_ready(
        position_wise_feed_forward(x2, params2, tf_cap=256))
    assert jnp.allclose(out3, ref2, atol=2e-2, rtol=2e-2), "case 3 mismatch"

    # --- Case 4: bf16 input/output with n_f>1 (f32 scratch accumulator) ---
    batch4, seq4, d_model4, d_ff4 = 2, 8, 128, 512
    kx4, kp4 = jax.random.split(krest)
    x4 = jax.random.normal(kx4, (batch4, seq4, d_model4)).astype(jnp.bfloat16)
    w1c, b1c, w2c, b2c = _make_params(kp4, d_model4, d_ff4)
    params4 = prepare_ffn_params(w1c, b1c, w2c, b2c)

    out4 = jax.block_until_ready(
        position_wise_feed_forward(x4, params4, tf_cap=128))
    ref4 = _reference(x4.reshape(-1, d_model4), w1c, b1c, w2c, b2c).reshape(x4.shape)
    assert out4.dtype == jnp.bfloat16
    assert jnp.allclose(out4.astype(jnp.float32), ref4.astype(jnp.float32),
                        atol=3e-2, rtol=3e-2), "case 4 mismatch"

    print("KERNEL_OK")
</pallas_src>

<mosaic_0001>
module attributes {stable_mosaic.version = 11 : i64} {
  func.func @_ffn_kernel_fused(%arg0: i32, %arg1: i32, %arg2: memref<16x128xbf16, #tpu.memory_space<vmem>>, %arg3: memref<128x128xbf16, #tpu.memory_space<vmem>>, %arg4: memref<1x128xf32, #tpu.memory_space<vmem>>, %arg5: memref<128x128xbf16, #tpu.memory_space<vmem>>, %arg6: memref<1x128xf32, #tpu.memory_space<vmem>>, %arg7: memref<16x128xf32, #tpu.memory_space<vmem>>) attributes {dimension_semantics = [#tpu.dimension_semantics<parallel>, #tpu.dimension_semantics<arbitrary>], iteration_bounds = array<i64: 1, 1>, scalar_prefetch = 0 : i64, scratch_operands = 0 : i64, tpu.core_type = #tpu.core_type<tc>, window_params = [{transform_indices = @transform_0, window_bounds = array<i64: 16, 128>}, {transform_indices = @transform_1, window_bounds = array<i64: 128, 128>}, {transform_indices = @transform_2, window_bounds = array<i64: 1, 128>}, {transform_indices = @transform_3, window_bounds = array<i64: 128, 128>}, {pipeline_mode = #tpu.pipeline_mode<synchronous>, transform_indices = @transform_4, window_bounds = array<i64: 1, 128>}, {transform_indices = @transform_5, window_bounds = array<i64: 16, 128>}]} {
    %c0 = arith.constant 0 : index
    %c0_0 = arith.constant 0 : index
    %0 = vector.load %arg2[%c0, %c0_0] : memref<16x128xbf16, #tpu.memory_space<vmem>>, vector<16x128xbf16>
    %c0_1 = arith.constant 0 : index
    %c0_2 = arith.constant 0 : index
    %1 = vector.load %arg3[%c0_1, %c0_2] : memref<128x128xbf16, #tpu.memory_space<vmem>>, vector<128x128xbf16>
    %cst = arith.constant dense<0.000000e+00> : vector<16x128xf32>
    %2 = tpu.matmul %0, %1, %cst {dimension_numbers = #tpu.dot_dimension_numbers<[1], [0], [0], [1], [0, 0, 1, 1], [], []>} : vector<16x128xbf16>, vector<128x128xbf16>, vector<16x128xf32> -> vector<16x128xf32>
    %c0_3 = arith.constant 0 : index
    %c0_4 = arith.constant 0 : index
    %3 = vector.load %arg4[%c0_3, %c0_4] : memref<1x128xf32, #tpu.memory_space<vmem>>, vector<1x128xf32>
    %4 = vector.broadcast %3 : vector<1x128xf32> to vector<16x128xf32>
    %5 = arith.addf %2, %4 : vector<16x128xf32>
    %cst_5 = arith.constant 0.000000e+00 : f32
    %6 = vector.broadcast %cst_5 : f32 to vector<16x128xf32>
    %7 = arith.maximumf %5, %6 : vector<16x128xf32>
    %8 = arith.truncf %7 : vector<16x128xf32> to vector<16x128xbf16>
    %c0_6 = arith.constant 0 : index
    %c0_7 = arith.constant 0 : index
    %9 = vector.load %arg5[%c0_6, %c0_7] : memref<128x128xbf16, #tpu.memory_space<vmem>>, vector<128x128xbf16>
    %cst_8 = arith.constant dense<0.000000e+00> : vector<16x128xf32>
    %10 = tpu.matmul %8, %9, %cst_8 {dimension_numbers = #tpu.dot_dimension_numbers<[1], [0], [0], [1], [0, 0, 1, 1], [], []>} : vector<16x128xbf16>, vector<128x128xbf16>, vector<16x128xf32> -> vector<16x128xf32>
    %c0_i32 = arith.constant 0 : i32
    %11 = arith.cmpi eq, %arg1, %c0_i32 : i32
    %12 = arith.extui %11 : i1 to i32
    %c0_i32_9 = arith.constant 0 : i32
    %13 = arith.cmpi ne, %12, %c0_i32_9 : i32
    scf.if %13 {
      %c0_12 = arith.constant 0 : index
      %c0_13 = arith.constant 0 : index
      %17 = vector.load %arg6[%c0_12, %c0_13] : memref<1x128xf32, #tpu.memory_space<vmem>>, vector<1x128xf32>
      %18 = vector.broadcast %17 : vector<1x128xf32> to vector<16x128xf32>
      %19 = arith.addf %10, %18 : vector<16x128xf32>
      %c0_14 = arith.constant 0 : index
      %c0_15 = arith.constant 0 : index
      %20 = vector.load %arg7[%c0_14, %c0_15] : memref<16x128xf32, #tpu.memory_space<vmem>>, vector<16x128xf32>
      tpu.vector_store %arg7[%c0_14, %c0_15], %19 {strides = array<i32>} : memref<16x128xf32, #tpu.memory_space<vmem>>, vector<16x128xf32>,
    } else {
    }
    %c0_i32_10 = arith.constant 0 : i32
    %14 = arith.cmpi sgt, %arg1, %c0_i32_10 : i32
    %15 = arith.extui %14 : i1 to i32
    %c0_i32_11 = arith.constant 0 : i32
    %16 = arith.cmpi ne, %15, %c0_i32_11 : i32
    scf.if %16 {
      %c0_12 = arith.constant 0 : index
      %c0_13 = arith.constant 0 : index
      %17 = vector.load %arg7[%c0_12, %c0_13] : memref<16x128xf32, #tpu.memory_space<vmem>>, vector<16x128xf32>
      %18 = arith.addf %17, %10 : vector<16x128xf32>
      %c0_14 = arith.constant 0 : index
      %c0_15 = arith.constant 0 : index
      %19 = vector.load %arg7[%c0_14, %c0_15] : memref<16x128xf32, #tpu.memory_space<vmem>>, vector<16x128xf32>
      tpu.vector_store %arg7[%c0_14, %c0_15], %18 {strides = array<i32>} : memref<16x128xf32, #tpu.memory_space<vmem>>, vector<16x128xf32>,
    } else {
    }
    return
  }
  func.func @transform_0(%arg0: i32, %arg1: i32) -> (i32, i32) {
    %c0_i32 = arith.constant 0 : i32
    %c0_i32_0 = arith.constant 0 : i32
    return %arg0, %c0_i32 : i32, i32
  }
  func.func @transform_1(%arg0: i32, %arg1: i32) -> (i32, i32) {
    %c0_i32 = arith.constant 0 : i32
    %c0_i32_0 = arith.constant 0 : i32
    return %c0_i32, %arg1 : i32, i32
  }
  func.func @transform_2(%arg0: i32, %arg1: i32) -> (i32, i32) {
    %c0_i32 = arith.constant 0 : i32
    %c0_i32_0 = arith.constant 0 : i32
    return %c0_i32, %arg1 : i32, i32
  }
  func.func @transform_3(%arg0: i32, %arg1: i32) -> (i32, i32) {
    %c0_i32 = arith.constant 0 : i32
    %c0_i32_0 = arith.constant 0 : i32
    return %arg1, %c0_i32 : i32, i32
  }
  func.func @transform_4(%arg0: i32, %arg1: i32) -> (i32, i32) {
    %c0_i32 = arith.constant 0 : i32
    %c0_i32_0 = arith.constant 0 : i32
    %c0_i32_1 = arith.constant 0 : i32
    return %c0_i32, %c0_i32_0 : i32, i32
  }
  func.func @transform_5(%arg0: i32, %arg1: i32) -> (i32, i32) {
    %c0_i32 = arith.constant 0 : i32
    %c0_i32_0 = arith.constant 0 : i32
    return %arg0, %c0_i32 : i32, i32
  }
}

</mosaic_0001>

<bundles_post_ra>
// kernel: tpu_custom_call.1
= control target key start
LH: loop header
LB: loop body
LE: loop exit
PB: predicated region body
PF: predicated region fallthrough
CT: control target
= control target key end

     0   :  { %10 = vsyncpa [#allocation3], 0  ;;  %s642_s0 = inlined_call_operand.hbm [shape: bf16[16,128], index: 0, kind: input, shape index: {}]   ;;  %s643_s1 = inlined_call_operand.hbm [shape: bf16[128,128], index: 1, kind: input, shape index: {}]   ;;  %s644_s2 = inlined_call_operand.vmem [shape: f32[1,128], index: 2, kind: input, shape index: {}]   ;;  %s645_s3 = inlined_call_operand.hbm [shape: bf16[128,128], index: 3, kind: input, shape index: {}]   ;;  %s646_s4 = inlined_call_operand.vmem [shape: f32[1,128], index: 4, kind: input, shape index: {}]   ;;  %s647_s5 = inlined_call_operand.hbm [shape: f32[16,128], index: 5, kind: output, shape index: {}]  }
   0x1   :  { %11 = vsyncpa [#allocation6], 0 }
   0x2   :  { %12 = vsyncpa [#allocation4], 0  ;;  %s532_s18 = smov [#allocation5]   ;;  %s533_s20 = smov [#allocation2]  }
   0x3   :  { %s30_s19 = sshll.u32 %s532_s18, 4  ;;  %s18_s21 = sshll.u32 %s533_s20, 4  ;;  %s31_s19 = int_to_ptr.vmem [resolvable:$true] %s30_s19  ;;  %s572_s21 = int_to_ptr.vmem [resolvable:$true] %s18_s21 }
   0x4   :  { %s438_s24 = scalar_lea.hbm %s643_s1, 1024 }
   0x5   :  { %p439_p0 = scmp.ne.s32.totalorder %s643_s1, %s438_s24  ;;  %p442_p1 = scmp.lt.u32.totalorder %s438_s24, %s643_s1 }
   0x7   :  { %p444_p2 = pnand %p442_p1, %p439_p0 }
   0x9   :  { %447 = shalt.err (!%p444_p2)
}
   0xa   :  { %s448_s29 = scalar_lea.vmem %s31_s19, 1024  ;;  %p453_p4 = scmp.lt.s32.totalorder %s31_s19, %s31_s19 }
   0xb   :  { %p449_p3 = scmp.ne.s32.totalorder %s31_s19, %s448_s29  ;;  %p454_p5 = scmp.lt.s32.totalorder %s448_s29, %s448_s29 }
   0xd   :  { %p455_p6 = por %p454_p5, %p453_p4 }
   0xf   :  { %p456_p7 = pnand %p455_p6, %p449_p3 }
  0x11   :  { %459 = shalt.err (!%p456_p7)
}
  0x12   :  { %s534_s30 = smov 64   ;;  %s535_s6 = smov 4  }
  0x13   :  { %36 = dma.hbm_to_vmem [thread:$0]  %s643_s1, 1024, %s31_s19, [#allocation6], %s534_s30, %s534_s30, %s535_s6  }
  0x14   :  { %s460_s11 = scalar_lea.hbm %s642_s0, 128 }
  0x15   :  { %p461_p8 = scmp.ne.s32.totalorder %s642_s0, %s460_s11  ;;  %p464_p9 = scmp.lt.u32.totalorder %s460_s11, %s642_s0 }
  0x17   :  { %p466_p10 = pnand %p464_p9, %p461_p8 }
  0x19   :  { %469 = shalt.err (!%p466_p10)
}
  0x1a   :  { %s470_s16 = scalar_lea.vmem %s572_s21, 128  ;;  %p475_p12 = scmp.lt.s32.totalorder %s572_s21, %s572_s21 }
  0x1b   :  { %p471_p11 = scmp.ne.s32.totalorder %s572_s21, %s470_s16  ;;  %p476_p13 = scmp.lt.s32.totalorder %s470_s16, %s470_s16 }
  0x1d   :  { %p477_p0 = por %p476_p13, %p475_p12 }
  0x1f   :  { %p478_p1 = pnand %p477_p0, %p471_p11 }
  0x21   :  { %481 = shalt.err (!%p478_p1)
}
  0x22   :  { %24 = dma.hbm_to_vmem [thread:$0]  %s642_s0, 128, %s572_s21, [#allocation3], %s534_s30, %s534_s30, %s535_s6  }
  0x23   :  { %s536_s18 = smov [#allocation7]   ;;  %s482_s23 = scalar_lea.hbm %s645_s3, 1024 }
  0x24   :  { %s44_s19 = sshll.u32 %s536_s18, 4  ;;  %p483_p2 = scmp.ne.s32.totalorder %s645_s3, %s482_s23  ;;  %s45_s19 = int_to_ptr.vmem [resolvable:$true] %s44_s19 }
  0x25   :  { %p486_p3 = scmp.lt.u32.totalorder %s482_s23, %s645_s3 }
  0x27   :  { %p488_p4 = pnand %p486_p3, %p483_p2 }
  0x29   :  { %491 = shalt.err (!%p488_p4)
}
  0x2a   :  { %s492_s28 = scalar_lea.vmem %s45_s19, 1024  ;;  %p497_p6 = scmp.lt.s32.totalorder %s45_s19, %s45_s19 }
  0x2b   :  { %p493_p5 = scmp.ne.s32.totalorder %s45_s19, %s492_s28  ;;  %p498_p7 = scmp.lt.s32.totalorder %s492_s28, %s492_s28 }
  0x2d   :  { %p499_p8 = por %p498_p7, %p497_p6 }
  0x2f   :  { %p500_p9 = pnand %p499_p8, %p493_p5 }
  0x31   :  { %503 = shalt.err (!%p500_p9)
}
  0x32   :  { %50 = dma.hbm_to_vmem [thread:$0]  %s645_s3, 1024, %s45_s19, [#allocation6], %s534_s30, %s534_s30, %s535_s6  }
  0x33   :  { %526 = dma.done.wait [#allocation3], 128  }
  0x34   :  { %527 = vsyncadd [#allocation3], 4294967168 }
  0x35   :  { %528 = dma.done.wait [#allocation6], 2048  }
  0x36   :  { %529 = vsyncadd [#allocation6], 4294965248  ;;  %v537_v0 = vmov 0.0   ;;  %vm538_vm0 = vmmov 0   ;;  %v421_v1 = vld [vmem:[#allocation5] sm:$0xff]   ;;  %v422_v2 = vld [vmem:[#allocation5 + $0x8] sm:$0xff]  }
  0x37   :  { %371 = vmatprep.subr.bf16.mxu0 %v537_v0  ;;  %387 = vmatprep.mubr.msk.bf16.mxu0 %vm538_vm0, %v537_v0  ;;  %v423_v3 = vld [vmem:[#allocation5 + $0x10] sm:$0xff]   ;;  %v430_v4 = vld [vmem:[#allocation7] sm:$0xff]   ;;  %v424_v5 = vld [vmem:[#allocation5 + $0x18] sm:$0xff]   ;;  %s539_s7 = smov [#allocation8]  }
  0x38   :  { %391 = vmatprep.subr.bf16.mxu1 %v537_v0  ;;  %407 = vmatprep.mubr.msk.bf16.mxu1 %vm538_vm0, %v537_v0  ;;  %v431_v6 = vld [vmem:[#allocation7 + $0x8] sm:$0xff]   ;;  %v425_v7 = vld [vmem:[#allocation5 + $0x20] sm:$0xff]   ;;  %v432_v8 = vld [vmem:[#allocation7 + $0x10] sm:$0xff]   ;;  %s321_s8 = sshll.u32 %s539_s7, 4  ;;  %s322_s8 = int_to_ptr.vmem [resolvable:$true] %s321_s8 }
  0x39   :  { %372 = vmatpush3.bf16.msra.mxu0 %v421_v1  ;;  %392 = vmatpush3.bf16.msra.mxu1 %v430_v4  ;;  %v426_v9 = vld [vmem:[#allocation5 + $0x28] sm:$0xff]   ;;  %v433_v10 = vld [vmem:[#allocation7 + $0x18] sm:$0xff]   ;;  %v427_v11 = vld [vmem:[#allocation5 + $0x30] sm:$0xff]   ;;  %p509_p11 = scmp.lt.s32.totalorder %s322_s8, %s322_s8 }
  0x3a   :  { %373 = vmatprep.subr.bf16.mxu0 %v537_v0  ;;  %393 = vmatprep.subr.bf16.mxu1 %v537_v0  ;;  %v434_v12 = vld [vmem:[#allocation7 + $0x20] sm:$0xff]   ;;  %v428_v13 = vld [vmem:[#allocation5 + $0x38] sm:$0xff]   ;;  %v435_v14 = vld [vmem:[#allocation7 + $0x28] sm:$0xff]  }
  0x3b   :  { %v429_v15 = vld [vmem:[#allocation2] sm:$0xff]   ;;  %v436_v16 = vld [vmem:[#allocation7 + $0x30] sm:$0xff]  }
  0x3c   :  { %v437_v17 = vld [vmem:[#allocation7 + $0x38] sm:$0xff]  }
  0x3d   :  { %374 = vmatpush3.bf16.msra.mxu0 %v422_v2  ;;  %394 = vmatpush3.bf16.msra.mxu1 %v431_v6  ;;  %v334_v18 = vld [vmem:[%s644_s2] ss:$0 sm:$0xff]  ;;  %s504_s2 = scalar_lea.vmem %s322_s8, 256 }
  0x3e   :  { %375 = vmatprep.subr.bf16.mxu0 %v537_v0  ;;  %395 = vmatprep.subr.bf16.mxu1 %v537_v0  ;;  %v352_v28 = vld [vmem:[%s646_s4] ss:$0 sm:$0xff]  ;;  %p505_p10 = scmp.ne.s32.totalorder %s322_s8, %s504_s2  ;;  %p510_p12 = scmp.lt.s32.totalorder %s504_s2, %s504_s2 }
  0x40   :  { %p511_p13 = por %p510_p12, %p509_p11 }
  0x41   :  { %376 = vmatpush3.bf16.msra.mxu0 %v423_v3  ;;  %396 = vmatpush3.bf16.msra.mxu1 %v432_v8 }
  0x42   :  { %377 = vmatprep.subr.bf16.mxu0 %v537_v0  ;;  %397 = vmatprep.subr.bf16.mxu1 %v537_v0  ;;  %p512_p0 = pnand %p511_p13, %p505_p10 }
  0x45   :  { %378 = vmatpush3.bf16.msra.mxu0 %v424_v5  ;;  %398 = vmatpush3.bf16.msra.mxu1 %v433_v10 }
  0x46   :  { %379 = vmatprep.subr.bf16.mxu0 %v537_v0  ;;  %399 = vmatprep.subr.bf16.mxu1 %v537_v0 }
  0x49   :  { %380 = vmatpush3.bf16.msra.mxu0 %v425_v7  ;;  %400 = vmatpush3.bf16.msra.mxu1 %v434_v12 }
  0x4a   :  { %381 = vmatprep.subr.bf16.mxu0 %v537_v0  ;;  %401 = vmatprep.subr.bf16.mxu1 %v537_v0 }
  0x4d   :  { %382 = vmatpush3.bf16.msra.mxu0 %v426_v9  ;;  %402 = vmatpush3.bf16.msra.mxu1 %v435_v14 }
  0x4e   :  { %383 = vmatprep.subr.bf16.mxu0 %v537_v0  ;;  %403 = vmatprep.subr.bf16.mxu1 %v537_v0 }
  0x51   :  { %384 = vmatpush3.bf16.msra.mxu0 %v427_v11  ;;  %404 = vmatpush3.bf16.msra.mxu1 %v436_v16 }
  0x52   :  { %385 = vmatprep.subr.bf16.mxu0 %v537_v0  ;;  %405 = vmatprep.subr.bf16.mxu1 %v537_v0 }
  0x55   :  { %386 = vmatpush3.bf16.msra.mxu0 %v428_v13  ;;  %406 = vmatpush3.bf16.msra.mxu1 %v437_v17 }
  0x58   :  { %388 = vmatmul.mubr.bf16.vlgmr.msra.gmra.mrb[0].mxu0 %v429_v15 }
 0x12b   :  { %v176_v19 = vpop.f32.mrb[0].mxu0 }
 0x12c   :  { %v177_v20 = vadd.f32 %v334_v18, %v176_v19  ;;  %v389_v21 = vpop.f32.mrb[1].mxu0 }
 0x12d   :  { %v179_v22 = vpop.f32.mrb[2].mxu0 }
 0x12e   :  { %v180_v23 = vadd.f32 %v334_v18, %v179_v22  ;;  %v390_v24 = vpop.f32.mrb[3].mxu0  ;;  %v183_v25 = vmax.f32 %v177_v20, 0.0 }
 0x130   :  { %v184_v26 = vmax.f32 %v180_v23, 0.0 }
 0x132   :  { %v185_v27 = vpack.c.bf16 %v184_v26, %v183_v25 }
 0x134   :  { %408 = vmatmul.mubr.bf16.vlgmr.msra.gmra.mrb[0].mxu1 %v185_v27 }
 0x207   :  { %v284_v29 = vpop.f32.mrb[0].mxu1 }
 0x208   :  { %v302_v30 = vadd.f32 %v352_v28, %v284_v29  ;;  %v409_v31 = vpop.f32.mrb[1].mxu1 }
 0x209   :  { %v287_v32 = vpop.f32.mrb[2].mxu1 }
 0x20a   :  { %304 = vst [vmem:[#allocation8] sm:$0xff] %v302_v30  ;;  %v303_v33 = vadd.f32 %v352_v28, %v287_v32  ;;  %v410_v34 = vpop.f32.mrb[3].mxu1 }
 0x20c   :  { %305 = vst [vmem:[#allocation8 + $0x8] sm:$0xff] %v303_v33 }
 0x20d   :  { %515 = shalt.err (!%p512_p0)
}
 0x20e   :  { %s516_s10 = scalar_lea.hbm %s647_s5, 256 }
 0x20f   :  { %p517_p1 = scmp.ne.s32.totalorder %s647_s5, %s516_s10  ;;  %p520_p2 = scmp.lt.u32.totalorder %s516_s10, %s647_s5 }
 0x211   :  { %p522_p3 = pnand %p520_p2, %p517_p1 }
 0x213   :  { %525 = shalt.err (!%p522_p3)
}
 0x214   :  { %s540_s15 = smov 128   ;;  %s541_s16 = smov 8  }
 0x215   :  { %327 = dma.vmem_to_hbm [thread:$0]  %s322_s8, 256, %s647_s5, [#allocation4], %s540_s15, %s540_s15, %s541_s16  }
 0x216   :  { %530 = dma.done.wait [#allocation4], 256  }
 0x217   :  { %531 = vsyncadd [#allocation4], 4294967040 }
 0x218   :  { %331 = vsyncpa [#allocation3], 1 }
 0x219   :  { %332 = vsyncpa [#allocation6], 1 }
 0x21a   :  { %333 = vsyncpa [#allocation4], 1 }

</bundles_post_ra>
